<compile_context>
chip_gen: v5e
topology: v5e:2x2
jax: 0.10.0
libtpu: 0.0.40
codegen_flags: <defaults>
</compile_context>

<pallas_src>
import math

import jax
import jax.numpy as jnp
from jax.experimental import pallas as pl
from jax.experimental.pallas import tpu as pltpu


def _batch_tile(batch):
    """128-row tiles (MXU-friendly) for prod batches; 8-row sublane tile for tiny B."""
    # TODO(synk): on v6e/v7x with B >= 256, a 256-row tile fills the 256-wide
    # MXU in one pass; keep >=2 blocks so v7x's 2nd TensorCore stays busy.
    if batch >= 128:
        return 128
    return ((batch + 7) // 8) * 8


# ----------------------------------------------------------------------------
# Pallas kernel: q_sample + denoiser + pred_x_start + eps-MSE + SDR, fused.
# ----------------------------------------------------------------------------
def _diff_audio_time_kernel(
    x_ref,       # (TB, L)  clean signal tile (f32)
    noise_ref,   # (TB, L)  gaussian noise tile (f32)
    coef_ref,    # (TB, 2)  [sqrt(ab), sqrt(1-ab)/sqrt(ab)]
    temb_ref,    # (TB, H)  sinusoidal time embedding (+ folded b1)
    w1_ref,      # (L, H)   bf16, VMEM-resident
    w2_ref,      # (H, L)   bf16, VMEM-resident
    b2_ref,      # (1, L)   f32,  VMEM-resident
    pred_ref,    # out: (TB, L) predicted x_start
    stats_ref,   # out: (TB, 2) [eps-MSE, -SDR] per sample
):
    x = x_ref[...]
    noise = noise_ref[...]
    sab = coef_ref[:, 0:1]            # sqrt(alphas_cumprod[t])
    ratio = coef_ref[:, 1:2]          # sqrt(1-ab)/sqrt(ab)
    s1mab = sab * ratio               # sqrt(1-ab)

    # --- q_sample: x_t = sqrt(ab) * x0 + sqrt(1 - ab) * eps -------------------
    x_t = sab * x + s1mab * noise

    # --- denoiser (eps-prediction): bf16 MXU operands, f32 accumulation -------
    # TODO(synk): stand-in MLP denoiser; the real Unet1D / TransformerDDPM
    # source is not part of the provided module snippet.
    h = jnp.dot(x_t.astype(jnp.bfloat16), w1_ref[...],
                preferred_element_type=jnp.float32) + temb_ref[...]
    h = jax.nn.gelu(h)
    eps_pred = jnp.dot(h.astype(jnp.bfloat16), w2_ref[...],
                       preferred_element_type=jnp.float32) + b2_ref[...]

    # --- pred_x0 = (x_t - s1mab*eps)/sab  ==  x + ratio*(noise - eps_pred) ----
    err = noise - eps_pred
    pred_x0 = x + ratio * err
    # TODO(synk): emit pred in bf16 on v5e (HBM-bound) if downstream tolerates it.
    pred_ref[...] = pred_x0

    # --- diffusion loss: per-sample mean squared eps error --------------------
    sum_err2 = jnp.sum(err * err, axis=-1, keepdims=True)
    mse = sum_err2 * jnp.float32(1.0 / x.shape[-1])

    # --- sdr_loss(x, pred_x0): reuses the eps-error reduction -----------------
    # sum((x - pred_x0)^2) == ratio^2 * sum(err^2)
    # TODO(synk): exact sdr_loss definition not in the snippet; standard
    # SDR = 10*log10(||x||^2 / ||x - x_hat||^2), loss = -SDR.
    den = (ratio * ratio) * sum_err2
    num = jnp.sum(x * x, axis=-1, keepdims=True)
    eps_c = jnp.float32(1e-8)
    ten_over_ln10 = jnp.float32(10.0 / math.log(10.0))
    sdr = (jnp.log(num + eps_c) - jnp.log(den + eps_c)) * ten_over_ln10

    # Single lane-dense store for both per-sample stats.
    stats_ref[...] = jnp.concatenate([mse, -sdr], axis=-1)


# ----------------------------------------------------------------------------
# Parameter / schedule setup (plain JAX glue, deterministic).
# ----------------------------------------------------------------------------
def init_params(key, seq_length=256, diff_dims=128, n_steps=1000):
    kw1, kw2 = jax.random.split(key)
    lim1 = 1.0 / math.sqrt(seq_length)
    lim2 = 1.0 / math.sqrt(diff_dims)
    # Weights stored bf16: MXU-native on v5e/v6e/v7x and half the weight DMA.
    w1 = jax.random.uniform(kw1, (seq_length, diff_dims), jnp.float32,
                            -lim1, lim1).astype(jnp.bfloat16)
    w2 = jax.random.uniform(kw2, (diff_dims, seq_length), jnp.float32,
                            -lim2, lim2).astype(jnp.bfloat16)
    b1 = jnp.zeros((1, diff_dims), jnp.float32)
    b2 = jnp.zeros((1, seq_length), jnp.float32)
    # Linear beta schedule, as in GaussianDiffusion1D / DenoiseDiffusion.
    betas = jnp.linspace(1e-4, 0.02, n_steps, dtype=jnp.float32)
    alphas_cumprod = jnp.cumprod(1.0 - betas)
    return {
        "w1": w1, "b1": b1, "w2": w2, "b2": b2,
        "alphas_cumprod": alphas_cumprod, "n_steps": n_steps,
        "diff_dims": diff_dims, "seq_length": seq_length,
    }


def _sinusoidal_time_embedding(t, dim):
    half = dim // 2
    freqs = jnp.exp(
        -math.log(10000.0) * jnp.arange(half, dtype=jnp.float32) / max(half - 1, 1)
    )
    args = t.astype(jnp.float32)[:, None] * freqs[None, :]
    return jnp.concatenate([jnp.sin(args), jnp.cos(args)], axis=-1)


# ----------------------------------------------------------------------------
# DiffAudioTime.forward equivalent.
# ----------------------------------------------------------------------------
def diff_audio_time_forward(x_bcl, params, key, t=None, cond=None):
    """x_bcl: (B, C=1, L) float32. Returns ({'diff_loss','neg_loss'}, pred_x_start)."""
    # TODO(synk): cond / self-conditioning / qtz-conditioning branches of the
    # original diff_model are not reproducible from the given source; cond ignored.
    B, C, L = x_bcl.shape
    assert C == 1, "GaussianDiffusion1D path uses inp_channels=1"
    H = params["diff_dims"]
    x = x_bcl[:, 0, :]

    k_t, k_n = jax.random.split(key)
    if t is None:
        t = jax.random.randint(k_t, (B,), 0, params["n_steps"])

    # Pad batch to a multiple of the batch tile.
    tb = _batch_tile(B)
    B_pad = ((B + tb - 1) // tb) * tb
    pad = B_pad - B
    if pad:
        x = jnp.pad(x, ((0, pad), (0, 0)))
        t = jnp.pad(t, ((0, pad),))

    # Gaussian noise generated wrapper-side (bit-reproducible; no in-kernel HW
    # PRNG, which has no interpret/CPU lowering).
    noise = jax.random.normal(k_n, (B_pad, L), jnp.float32)

    ab = params["alphas_cumprod"][t]
    sab = jnp.sqrt(ab)[:, None]
    s1mab = jnp.sqrt(1.0 - ab)[:, None]
    coef = jnp.concatenate([sab, s1mab / sab], axis=-1)          # (B_pad, 2)
    temb = _sinusoidal_time_embedding(t, H) + params["b1"]       # b1 folded in

    n_blocks = B_pad // tb
    grid_spec = pltpu.PrefetchScalarGridSpec(
        num_scalar_prefetch=0,
        grid=(n_blocks,),
        in_specs=[
            pl.BlockSpec((tb, L), lambda i: (i, 0)),   # x
            pl.BlockSpec((tb, L), lambda i: (i, 0)),   # noise
            pl.BlockSpec((tb, 2), lambda i: (i, 0)),   # coef
            pl.BlockSpec((tb, H), lambda i: (i, 0)),   # temb
            pl.BlockSpec((L, H),  lambda i: (0, 0)),   # w1 (VMEM-resident)
            pl.BlockSpec((H, L),  lambda i: (0, 0)),   # w2 (VMEM-resident)
            pl.BlockSpec((1, L),  lambda i: (0, 0)),   # b2 (VMEM-resident)
        ],
        out_specs=(
            pl.BlockSpec((tb, L), lambda i: (i, 0)),   # pred_x_start
            pl.BlockSpec((tb, 2), lambda i: (i, 0)),   # [mse, -sdr]
        ),
    )
    # TODO(synk): mark w1/w2/b2 pipeline_mode=pl.Buffered(1) (grid-invariant)
    # and add a K-tiled "arbitrary" axis + explicit vmem_limit_bytes against
    # v7x's 64 MiB budget once the real denoiser's weights approach ~24 MiB.
    cost = pl.CostEstimate(
        flops=4 * B_pad * L * H + 12 * B_pad * L,
        transcendentals=B_pad * H + 4 * B_pad,
        bytes_accessed=4 * (3 * B_pad * L + B_pad * H + 4 * B_pad + L)
                       + 2 * (2 * L * H),
    )
    pred, stats = pl.pallas_call(
        _diff_audio_time_kernel,
        out_shape=(jax.ShapeDtypeStruct((B_pad, L), jnp.float32),
                   jax.ShapeDtypeStruct((B_pad, 2), jnp.float32)),
        grid_spec=grid_spec,
        compiler_params=pltpu.CompilerParams(
            dimension_semantics=("parallel",)),
        cost_estimate=cost,
    )(x, noise, coef, temb, params["w1"], params["w2"], params["b2"])

    diff_loss = jnp.mean(stats[:B, 0])
    neg_loss = jnp.mean(stats[:B, 1])
    predicted_x_start = pred[:B, None, :]   # back to (B, 1, L)
    return {"diff_loss": diff_loss, "neg_loss": neg_loss}, predicted_x_start


# ----------------------------------------------------------------------------
if __name__ == "__main__":
    key = jax.random.PRNGKey(0)
    k_param, k_data, k_fwd = jax.random.split(key, 3)

    B, C, L, H = 4, 1, 256, 128  # small shapes: batch=4, channels=1, seq=256, hidden=128
    params = init_params(k_param, seq_length=L, diff_dims=H, n_steps=1000)
    x = jax.random.normal(k_data, (B, C, L), jnp.float32)

    losses, pred_x_start = diff_audio_time_forward(x, params, k_fwd)
    jax.block_until_ready((losses, pred_x_start))

    assert pred_x_start.shape == (B, C, L)
    assert jnp.isfinite(losses["diff_loss"]) and jnp.isfinite(losses["neg_loss"])
    print("KERNEL_OK")
</pallas_src>

<mosaic_0001>
module attributes {stable_mosaic.version = 11 : i64} {
  func.func @_diff_audio_time_kernel(%arg0: i32, %arg1: memref<8x256xf32, #tpu.memory_space<vmem>>, %arg2: memref<8x256xf32, #tpu.memory_space<vmem>>, %arg3: memref<8x2xf32, #tpu.memory_space<vmem>>, %arg4: memref<8x128xf32, #tpu.memory_space<vmem>>, %arg5: memref<256x128xbf16, #tpu.memory_space<vmem>>, %arg6: memref<128x256xbf16, #tpu.memory_space<vmem>>, %arg7: memref<1x256xf32, #tpu.memory_space<vmem>>, %arg8: memref<8x256xf32, #tpu.memory_space<vmem>>, %arg9: memref<8x2xf32, #tpu.memory_space<vmem>>) attributes {dimension_semantics = [#tpu.dimension_semantics<parallel>], iteration_bounds = array<i64: 1>, scalar_prefetch = 0 : i64, scratch_operands = 0 : i64, tpu.core_type = #tpu.core_type<tc>, window_params = [{transform_indices = @transform_0, window_bounds = array<i64: 8, 256>}, {transform_indices = @transform_1, window_bounds = array<i64: 8, 256>}, {transform_indices = @transform_2, window_bounds = array<i64: 8, 2>}, {transform_indices = @transform_3, window_bounds = array<i64: 8, 128>}, {pipeline_mode = #tpu.pipeline_mode<synchronous>, transform_indices = @transform_4, window_bounds = array<i64: 256, 128>}, {pipeline_mode = #tpu.pipeline_mode<synchronous>, transform_indices = @transform_5, window_bounds = array<i64: 128, 256>}, {pipeline_mode = #tpu.pipeline_mode<synchronous>, transform_indices = @transform_6, window_bounds = array<i64: 1, 256>}, {transform_indices = @transform_7, window_bounds = array<i64: 8, 256>}, {transform_indices = @transform_8, window_bounds = array<i64: 8, 2>}]} {
    %c0 = arith.constant 0 : index
    %c0_0 = arith.constant 0 : index
    %0 = vector.load %arg1[%c0, %c0_0] : memref<8x256xf32, #tpu.memory_space<vmem>>, vector<8x256xf32>
    %c0_1 = arith.constant 0 : index
    %c0_2 = arith.constant 0 : index
    %1 = vector.load %arg2[%c0_1, %c0_2] : memref<8x256xf32, #tpu.memory_space<vmem>>, vector<8x256xf32>
    %c0_3 = arith.constant 0 : index
    %c0_4 = arith.constant 0 : index
    %2 = vector.load %arg3[%c0_3, %c0_4] : memref<8x2xf32, #tpu.memory_space<vmem>>, vector<8x1xf32>
    %c0_5 = arith.constant 0 : index
    %c1 = arith.constant 1 : index
    %3 = vector.load %arg3[%c0_5, %c1] : memref<8x2xf32, #tpu.memory_space<vmem>>, vector<8x1xf32>
    %4 = arith.mulf %2, %3 : vector<8x1xf32>
    %5 = vector.broadcast %2 : vector<8x1xf32> to vector<8x256xf32>
    %6 = arith.mulf %5, %0 : vector<8x256xf32>
    %7 = vector.broadcast %4 : vector<8x1xf32> to vector<8x256xf32>
    %8 = arith.mulf %7, %1 : vector<8x256xf32>
    %9 = arith.addf %6, %8 : vector<8x256xf32>
    %10 = arith.truncf %9 : vector<8x256xf32> to vector<8x256xbf16>
    %c0_6 = arith.constant 0 : index
    %c0_7 = arith.constant 0 : index
    %11 = vector.load %arg5[%c0_6, %c0_7] : memref<256x128xbf16, #tpu.memory_space<vmem>>, vector<256x128xbf16>
    %cst = arith.constant dense<0.000000e+00> : vector<8x128xf32>
    %12 = tpu.matmul %10, %11, %cst {dimension_numbers = #tpu.dot_dimension_numbers<[1], [0], [0], [1], [0, 0, 1, 1], [], []>} : vector<8x256xbf16>, vector<256x128xbf16>, vector<8x128xf32> -> vector<8x128xf32>
    %c0_8 = arith.constant 0 : index
    %c0_9 = arith.constant 0 : index
    %13 = vector.load %arg4[%c0_8, %c0_9] : memref<8x128xf32, #tpu.memory_space<vmem>>, vector<8x128xf32>
    %14 = arith.addf %12, %13 : vector<8x128xf32>
    %15 = arith.mulf %14, %14 : vector<8x128xf32>
    %16 = arith.mulf %14, %15 : vector<8x128xf32>
    %cst_10 = arith.constant 4.471500e-02 : f32
    %17 = vector.broadcast %cst_10 : f32 to vector<8x128xf32>
    %18 = arith.mulf %17, %16 : vector<8x128xf32>
    %19 = arith.addf %14, %18 : vector<8x128xf32>
    %cst_11 = arith.constant 0.797884583 : f32
    %20 = vector.broadcast %cst_11 : f32 to vector<8x128xf32>
    %21 = arith.mulf %20, %19 : vector<8x128xf32>
    %22 = math.tanh %21 : vector<8x128xf32>
    %cst_12 = arith.constant 1.000000e+00 : f32
    %23 = vector.broadcast %cst_12 : f32 to vector<8x128xf32>
    %24 = arith.addf %23, %22 : vector<8x128xf32>
    %cst_13 = arith.constant 5.000000e-01 : f32
    %25 = vector.broadcast %cst_13 : f32 to vector<8x128xf32>
    %26 = arith.mulf %25, %24 : vector<8x128xf32>
    %27 = arith.mulf %14, %26 : vector<8x128xf32>
    %28 = arith.truncf %27 : vector<8x128xf32> to vector<8x128xbf16>
    %c0_14 = arith.constant 0 : index
    %c0_15 = arith.constant 0 : index
    %29 = vector.load %arg6[%c0_14, %c0_15] : memref<128x256xbf16, #tpu.memory_space<vmem>>, vector<128x256xbf16>
    %cst_16 = arith.constant dense<0.000000e+00> : vector<8x256xf32>
    %30 = tpu.matmul %28, %29, %cst_16 {dimension_numbers = #tpu.dot_dimension_numbers<[1], [0], [0], [1], [0, 0, 1, 1], [], []>} : vector<8x128xbf16>, vector<128x256xbf16>, vector<8x256xf32> -> vector<8x256xf32>
    %c0_17 = arith.constant 0 : index
    %c0_18 = arith.constant 0 : index
    %31 = vector.load %arg7[%c0_17, %c0_18] : memref<1x256xf32, #tpu.memory_space<vmem>>, vector<1x256xf32>
    %32 = vector.broadcast %31 : vector<1x256xf32> to vector<8x256xf32>
    %33 = arith.addf %30, %32 : vector<8x256xf32>
    %34 = arith.subf %1, %33 : vector<8x256xf32>
    %35 = vector.broadcast %3 : vector<8x1xf32> to vector<8x256xf32>
    %36 = arith.mulf %35, %34 : vector<8x256xf32>
    %37 = arith.addf %0, %36 : vector<8x256xf32>
    %c0_19 = arith.constant 0 : index
    %c0_20 = arith.constant 0 : index
    %38 = vector.load %arg8[%c0_19, %c0_20] : memref<8x256xf32, #tpu.memory_space<vmem>>, vector<8x256xf32>
    tpu.vector_store %arg8[%c0_19, %c0_20], %37 {strides = array<i32>} : memref<8x256xf32, #tpu.memory_space<vmem>>, vector<8x256xf32>,
    %39 = arith.mulf %34, %34 : vector<8x256xf32>
    %cst_21 = arith.constant dense<0.000000e+00> : vector<8xf32>
    %40 = vector.multi_reduction <add>, %39, %cst_21 [1] : vector<8x256xf32> to vector<8xf32>
    %41 = vector.shape_cast %40 : vector<8xf32> to vector<8x1xf32>
    %cst_22 = arith.constant 3.906250e-03 : f32
    %42 = vector.broadcast %cst_22 : f32 to vector<8x1xf32>
    %43 = arith.mulf %41, %42 : vector<8x1xf32>
    %44 = arith.mulf %3, %3 : vector<8x1xf32>
    %45 = arith.mulf %44, %41 : vector<8x1xf32>
    %46 = arith.mulf %0, %0 : vector<8x256xf32>
    %cst_23 = arith.constant dense<0.000000e+00> : vector<8xf32>
    %47 = vector.multi_reduction <add>, %46, %cst_23 [1] : vector<8x256xf32> to vector<8xf32>
    %48 = vector.shape_cast %47 : vector<8xf32> to vector<8x1xf32>
    %cst_24 = arith.constant 9.99999993E-9 : f32
    %49 = vector.broadcast %cst_24 : f32 to vector<8x1xf32>
    %50 = arith.addf %48, %49 : vector<8x1xf32>
    %51 = math.log %50 : vector<8x1xf32>
    %cst_25 = arith.constant 9.99999993E-9 : f32
    %52 = vector.broadcast %cst_25 : f32 to vector<8x1xf32>
    %53 = arith.addf %45, %52 : vector<8x1xf32>
    %54 = math.log %53 : vector<8x1xf32>
    %55 = arith.subf %51, %54 : vector<8x1xf32>
    %cst_26 = arith.constant 4.34294462 : f32
    %56 = vector.broadcast %cst_26 : f32 to vector<8x1xf32>
    %57 = arith.mulf %55, %56 : vector<8x1xf32>
    %cst_27 = arith.constant 0.000000e+00 : f32
    %58 = vector.broadcast %cst_27 : f32 to vector<8x1xf32>
    %59 = arith.subf %58, %57 : vector<8x1xf32>
    %60 = tpu.concatenate %43, %59 in 1 : vector<8x1xf32>, vector<8x1xf32> -> vector<8x2xf32>
    %c0_28 = arith.constant 0 : index
    %c0_29 = arith.constant 0 : index
    %61 = vector.load %arg9[%c0_28, %c0_29] : memref<8x2xf32, #tpu.memory_space<vmem>>, vector<8x2xf32>
    tpu.vector_store %arg9[%c0_28, %c0_29], %60 {strides = array<i32>} : memref<8x2xf32, #tpu.memory_space<vmem>>, vector<8x2xf32>,
    return
  }
  func.func @transform_0(%arg0: i32) -> (i32, i32) {
    %c0_i32 = arith.constant 0 : i32
    %c0_i32_0 = arith.constant 0 : i32
    return %arg0, %c0_i32 : i32, i32
  }
  func.func @transform_1(%arg0: i32) -> (i32, i32) {
    %c0_i32 = arith.constant 0 : i32
    %c0_i32_0 = arith.constant 0 : i32
    return %arg0, %c0_i32 : i32, i32
  }
  func.func @transform_2(%arg0: i32) -> (i32, i32) {
    %c0_i32 = arith.constant 0 : i32
    %c0_i32_0 = arith.constant 0 : i32
    return %arg0, %c0_i32 : i32, i32
  }
  func.func @transform_3(%arg0: i32) -> (i32, i32) {
    %c0_i32 = arith.constant 0 : i32
    %c0_i32_0 = arith.constant 0 : i32
    return %arg0, %c0_i32 : i32, i32
  }
  func.func @transform_4(%arg0: i32) -> (i32, i32) {
    %c0_i32 = arith.constant 0 : i32
    %c0_i32_0 = arith.constant 0 : i32
    %c0_i32_1 = arith.constant 0 : i32
    return %c0_i32, %c0_i32_0 : i32, i32
  }
  func.func @transform_5(%arg0: i32) -> (i32, i32) {
    %c0_i32 = arith.constant 0 : i32
    %c0_i32_0 = arith.constant 0 : i32
    %c0_i32_1 = arith.constant 0 : i32
    return %c0_i32, %c0_i32_0 : i32, i32
  }
  func.func @transform_6(%arg0: i32) -> (i32, i32) {
    %c0_i32 = arith.constant 0 : i32
    %c0_i32_0 = arith.constant 0 : i32
    %c0_i32_1 = arith.constant 0 : i32
    return %c0_i32, %c0_i32_0 : i32, i32
  }
  func.func @transform_7(%arg0: i32) -> (i32, i32) {
    %c0_i32 = arith.constant 0 : i32
    %c0_i32_0 = arith.constant 0 : i32
    return %arg0, %c0_i32 : i32, i32
  }
  func.func @transform_8(%arg0: i32) -> (i32, i32) {
    %c0_i32 = arith.constant 0 : i32
    %c0_i32_0 = arith.constant 0 : i32
    return %arg0, %c0_i32 : i32, i32
  }
}

</mosaic_0001>

<bundles_post_ra>
// kernel: tpu_custom_call.1
= control target key start
LH: loop header
LB: loop body
LE: loop exit
PB: predicated region body
PF: predicated region fallthrough
CT: control target
= control target key end

     0   :  { %14 = vsyncpa [#allocation3], 0  ;;  %s891_s0 = inlined_call_operand.hbm [shape: f32[8,256], index: 0, kind: input, shape index: {}]   ;;  %s892_s1 = inlined_call_operand.hbm [shape: f32[8,256], index: 1, kind: input, shape index: {}]   ;;  %s893_s2 = inlined_call_operand.vmem [shape: f32[8,2], index: 2, kind: input, shape index: {}]   ;;  %s894_s3 = inlined_call_operand.vmem [shape: f32[8,128], index: 3, kind: input, shape index: {}]   ;;  %s895_s4 = inlined_call_operand.hbm [shape: bf16[256,128], index: 4, kind: input, shape index: {}]   ;;  %s896_s5 = inlined_call_operand.hbm [shape: bf16[128,256], index: 5, kind: input, shape index: {}]   ;;  %s897_s6 = inlined_call_operand.vmem [shape: f32[1,256], index: 6, kind: input, shape index: {}]   ;;  %s898_s7 = inlined_call_operand.hbm [shape: f32[8,256], index: 7, kind: output, shape index: {0}]   ;;  %s899_s8 = inlined_call_operand.vmem [shape: f32[8,2], index: 8, kind: output, shape index: {1}]  }
   0x1   :  { %15 = vsyncpa [#allocation6], 0 }
   0x2   :  { %16 = vsyncpa [#allocation9], 0  ;;  %s34_s29 = sshll.u32 %s892_s1, 4  ;;  %s35_s29 = int_to_ptr.hbm [resolvable:$true] %s34_s29 }
   0x3   :  { %17 = vsyncpa [#allocation4], 0  ;;  %s779_s30 = smov [#allocation5]   ;;  %s23_s12 = sshll.u32 %s891_s0, 4  ;;  %s24_s12 = int_to_ptr.hbm [resolvable:$true] %s23_s12 }
   0x4   :  { %s36_s9 = sshll.u32 %s779_s30, 4  ;;  %s780_s13 = smov [#allocation2]   ;;  %s37_s9 = int_to_ptr.vmem [resolvable:$true] %s36_s9 }
   0x5   :  { %39 = dma.hbm_to_vmem [thread:$0]  %s35_s29, 256, %s37_s9, [#allocation6]  }
   0x6   :  { %s25_s14 = sshll.u32 %s780_s13, 4  ;;  %s48_s17 = sshll.u32 %s895_s4, 4  ;;  %s26_s14 = int_to_ptr.vmem [resolvable:$true] %s25_s14  ;;  %s49_s17 = int_to_ptr.hbm [resolvable:$true] %s48_s17 }
   0x7   :  { %28 = dma.hbm_to_vmem [thread:$0]  %s24_s12, 256, %s26_s14, [#allocation3]  }
   0x8   :  { %s781_s1 = smov [#allocation7]   ;;  %s61_s21 = sshll.u32 %s896_s5, 4  ;;  %s62_s21 = int_to_ptr.hbm [resolvable:$true] %s61_s21 }
   0x9   :  { %s50_s18 = sshll.u32 %s781_s1, 4  ;;  %s782_s22 = smov 64   ;;  %s51_s18 = int_to_ptr.vmem [resolvable:$true] %s50_s18 }
   0xa   :  { %s783_s0 = smov 4   ;;  %s784_s23 = smov [#allocation8]  }
   0xb   :  { %56 = dma.hbm_to_vmem [thread:$0]  %s49_s17, 2048, %s51_s18, [#allocation6], %s782_s22, %s782_s22, %s783_s0  }
   0xc   :  { %s63_s24 = sshll.u32 %s784_s23, 4  ;;  %s785_s25 = smov 128   ;;  %s64_s24 = int_to_ptr.vmem [resolvable:$true] %s63_s24 }
   0xd   :  { %s786_s26 = smov 8  }
   0xe   :  { %69 = dma.hbm_to_vmem [thread:$0]  %s62_s21, 2048, %s64_s24, [#allocation9], %s785_s25, %s785_s25, %s786_s26  }
   0xf   :  { %771 = dma.done.wait [#allocation3], 256  }
  0x10   :  { %772 = vsyncadd [#allocation3], 4294967040 }
  0x11   :  { %773 = dma.done.wait [#allocation6], 2304  }
  0x12   :  { %774 = vsyncadd [#allocation6], 4294964992 }
  0x13   :  { %775 = dma.done.wait [#allocation9], 2048  }
  0x14   :  { %776 = vsyncadd [#allocation9], 4294965248  ;;  %v851_v0 = vld [vmem:[%s893_s2] sm:$0xff]  ;;  %s787_s5 = smov 127   ;;  %v788_v1 = vmov 0   ;;  %v604_v2 = vld [vmem:[#allocation7 + $0x38] sm:$0xff] }
  0x15   :  { %94 = vrot.lane.b32.xlu0 %v851_v0, %s787_s5  ;;  %642 = vset.pattern.permute.xlu1 %v788_v1  ;;  %v612_v3 = vld [vmem:[#allocation7 + $0x78] sm:$0xff]  ;;  %v603_v4 = vld [vmem:[#allocation7 + $0x30] sm:$0xff]  ;;  %v602_v6 = vld [vmem:[#allocation7 + $0x28] sm:$0xff]  ;;  %s453_s11 = sshll.u32 %s898_s7, 4  ;;  %vm442_vm0 = vcmask 7168   ;;  %vm444_vm1 = vcmask 15360   ;;  %s454_s11 = int_to_ptr.hbm [resolvable:$true] %s453_s11 }
  0x16   :  { %641 = vset.pattern.permute.xlu0 %v788_v1  ;;  %244 = vmatpush.bf16.msra.mxu0 %v604_v2  ;;  %v611_v5 = vld [vmem:[#allocation7 + $0x70] sm:$0xff]  ;;  %v610_v7 = vld [vmem:[#allocation7 + $0x68] sm:$0xff]  ;;  %v601_v8 = vld [vmem:[#allocation7 + $0x20] sm:$0xff] }
  0x17   :  { %257 = vmatpush.bf16.msra.mxu1 %v612_v3  ;;  %v609_v9 = vld [vmem:[#allocation7 + $0x60] sm:$0xff]  ;;  %v600_v10 = vld [vmem:[#allocation7 + $0x18] sm:$0xff]  ;;  %v599_v12 = vld [vmem:[#allocation7 + $0x10] sm:$0xff] }
  0x18   :  { %v608_v11 = vld [vmem:[#allocation7 + $0x58] sm:$0xff]  ;;  %v607_v13 = vld [vmem:[#allocation7 + $0x50] sm:$0xff]  ;;  %v598_v14 = vld [vmem:[#allocation7 + $0x8] sm:$0xff] }
  0x19   :  { %v606_v15 = vld [vmem:[#allocation7 + $0x48] sm:$0xff]  ;;  %v597_v18 = vld [vmem:[#allocation7] sm:$0xff]  ;;  %v591_v20 = vld [vmem:[#allocation8 + $0x70] sm:$0xf] }
  0x1a   :  { %245 = vmatpush.bf16.msra.mxu0 %v603_v4  ;;  %v605_v19 = vld [vmem:[#allocation7 + $0x40] sm:$0xff]  ;;  %v628_v21 = vld [vmem:[#allocation8 + $0x74] sm:$0xf0]  ;;  %v627_v22 = vld [vmem:[#allocation8 + $0x74] sm:$0xf] }
  0x1b   :  { %258 = vmatpush.bf16.msra.mxu1 %v611_v5  ;;  %v592_v23 = vor.u32 %v628_v21, %v591_v20  ;;  %v593_v24 = vld [vmem:[#allocation8 + $0x78] sm:$0xf0]  ;;  %v856_v27 = vld [vmem:[#allocation2] sm:$0xff]  ;;  %v858_v28 = vld [vmem:[#allocation2 + $0x8] sm:$0xff] }
  0x1c   :  { %v596_v25 = vor.u32 %v627_v22, %v593_v24  ;;  %v860_v29 = vld [vmem:[#allocation5] sm:$0xff]  ;;  %v862_v30 = vld [vmem:[#allocation5 + $0x8] sm:$0xff]  ;;  %v583_v40 = vld [vmem:[#allocation8 + $0x60] sm:$0xf]  ;;  %v428_v20 = vmul.f32 %v856_v27, %v856_v27  ;;  %v429_v21 = vmul.f32 %v858_v28, %v858_v28  ;;  %v789_v22 = vmov 1  }
  0x1d   :  { %99 = vperm.xlu0 %641, %v851_v0   ;;  %382 = vmatpush.bf16.msra.mxu2 %v592_v23  ;;  %v626_v41 = vld [vmem:[#allocation8 + $0x64] sm:$0xf0]  ;;  %v625_v42 = vld [vmem:[#allocation8 + $0x64] sm:$0xf]  ;;  %v585_v44 = vld [vmem:[#allocation8 + $0x68] sm:$0xf0] }
  0x1e   :  { %246 = vmatpush.bf16.msra.mxu0 %v602_v6  ;;  %395 = vmatpush.bf16.msra.mxu3 %v596_v25  ;;  %v584_v43 = vor.u32 %v626_v41, %v583_v40  ;;  %v588_v45 = vor.u32 %v625_v42, %v585_v44  ;;  %v575_v46 = vld [vmem:[#allocation8 + $0x50] sm:$0xf]  ;;  %v624_v47 = vld [vmem:[#allocation8 + $0x54] sm:$0xf0]  ;;  %v623_v48 = vld [vmem:[#allocation8 + $0x54] sm:$0xf]  ;;  %v430_v25 = vadd.f32 %v429_v21, %v428_v20 }
  0x1f   :  { %259 = vmatpush.bf16.msra.mxu1 %v610_v7  ;;  %v576_v49 = vor.u32 %v624_v47, %v575_v46  ;;  %v577_v50 = vld [vmem:[#allocation8 + $0x58] sm:$0xf0]  ;;  %v567_v52 = vld [vmem:[#allocation8 + $0x40] sm:$0xf]  ;;  %v622_v53 = vld [vmem:[#allocation8 + $0x44] sm:$0xf0]  ;;  %643 = vset.pattern.permute.xlu2 %v789_v22 }
  0x20   :  { %v580_v51 = vor.u32 %v623_v48, %v577_v50  ;;  %v621_v54 = vld [vmem:[#allocation8 + $0x44] sm:$0xf]  ;;  %v568_v55 = vor.u32 %v622_v53, %v567_v52  ;;  %v569_v56 = vld [vmem:[#allocation8 + $0x48] sm:$0xf0]  ;;  %v559_v57 = vld [vmem:[#allocation8 + $0x30] sm:$0xf]  ;;  %431 = vadd.xlane.f32.xlu2 %v430_v25 }
  0x21   :  { %383 = vmatpush.bf16.msra.mxu2 %v584_v43  ;;  %v620_v58 = vld [vmem:[#allocation8 + $0x34] sm:$0xf0]  ;;  %v572_v59 = vor.u32 %v621_v54, %v569_v56  ;;  %v619_v60 = vld [vmem:[#allocation8 + $0x34] sm:$0xf]  ;;  %v561_v61 = vld [vmem:[#allocation8 + $0x38] sm:$0xf0] }
  0x22   :  { %247 = vmatpush.bf16.msra.mxu0 %v601_v8  ;;  %396 = vmatpush.bf16.msra.mxu3 %v588_v45  ;;  %v560_v62 = vor.u32 %v620_v58, %v559_v57  ;;  %v564_v63 = vor.u32 %v619_v60, %v561_v61  ;;  %v551_v1 = vld [vmem:[#allocation8 + $0x20] sm:$0xf]  ;;  %v618_v2 = vld [vmem:[#allocation8 + $0x24] sm:$0xf0]  ;;  %v617_v3 = vld [vmem:[#allocation8 + $0x24] sm:$0xf] }
  0x23   :  { %260 = vmatpush.bf16.msra.mxu1 %v609_v9  ;;  %v553_v4 = vld [vmem:[#allocation8 + $0x28] sm:$0xf0]  ;;  %v552_v5 = vor.u32 %v618_v2, %v551_v1  ;;  %v543_v7 = vld [vmem:[#allocation8 + $0x10] sm:$0xf]  ;;  %v616_v8 = vld [vmem:[#allocation8 + $0x14] sm:$0xf0] }
  0x24   :  { %v556_v6 = vor.u32 %v617_v3, %v553_v4  ;;  %v615_v9 = vld [vmem:[#allocation8 + $0x14] sm:$0xf]  ;;  %v296_v45 = vld [vmem:[%s897_s6] sm:$0x3]  ;;  %s790_s6 = smov [#allocation10]  }
  0x25   :  { %384 = vmatpush.bf16.msra.mxu2 %v576_v49  ;;  %644 = vset.pattern.permute.xlu0 %v789_v22  ;;  %v298_v46 = vperm.slane %v296_v45, 0  ;;  %v299_v47 = vperm.slane %v296_v45, 1  ;;  %s451_s30 = sshll.u32 %s790_s6, 4  ;;  %s452_s30 = int_to_ptr.vmem [resolvable:$true] %s451_s30 }
  0x26   :  { %248 = vmatpush.bf16.msra.mxu0 %v600_v10  ;;  %397 = vmatpush.bf16.msra.mxu3 %v580_v51  ;;  %v545_v10 = vld [vmem:[#allocation8 + $0x18] sm:$0xf0] }
  0x27   :  { %261 = vmatpush.bf16.msra.mxu1 %v608_v11  ;;  %v544_v11 = vor.u32 %v616_v8, %v543_v7 }
  0x29   :  { %385 = vmatpush.bf16.msra.mxu2 %v568_v55 }
  0x2a   :  { %249 = vmatpush.bf16.msra.mxu0 %v599_v12  ;;  %398 = vmatpush.bf16.msra.mxu3 %v572_v59  ;;  %v548_v12 = vor.u32 %v615_v9, %v545_v10 }
  0x2b   :  { %262 = vmatpush.bf16.msra.mxu1 %v607_v13  ;;  %v535_v13 = vld [vmem:[#allocation8] sm:$0xf] }
  0x2d   :  { %386 = vmatpush.bf16.msra.mxu2 %v560_v62 }
  0x2e   :  { %250 = vmatpush.bf16.msra.mxu0 %v598_v14  ;;  %399 = vmatpush.bf16.msra.mxu3 %v564_v63  ;;  %v614_v14 = vld [vmem:[#allocation8 + $0x4] sm:$0xf0] }
  0x2f   :  { %263 = vmatpush.bf16.msra.mxu1 %v606_v15  ;;  %v613_v15 = vld [vmem:[#allocation8 + $0x4] sm:$0xf] }
  0x31   :  { %387 = vmatpush.bf16.msra.mxu2 %v552_v5 }
  0x32   :  { %251 = vmatpush.bf16.msra.mxu0 %v597_v18  ;;  %400 = vmatpush.bf16.msra.mxu3 %v556_v6 }
  0x33   :  { %264 = vmatpush.bf16.msra.mxu1 %v605_v19  ;;  %v147_v19 = vld [vmem:[%s894_s3] sm:$0xff] }
  0x35   :  { %388 = vmatpush.bf16.msra.mxu2 %v544_v11 }
  0x36   :  { %401 = vmatpush.bf16.msra.mxu3 %v548_v12 }
  0x38   :  { %411 = vperm.xlu2 %643, %v851_v0  }
  0x87   :  { %v95_v16 = vpop.permute.xlu0 %94 }
  0x88   :  { %v97_v17 = vmul.f32 %v95_v16, %v851_v0  ;;  %v537_v16 = vld [vmem:[#allocation8 + $0x8] sm:$0xf0] }
  0x89   :  { %v540_v18 = vor.u32 %v613_v15, %v537_v16 }
  0x8a   :  { %106 = vperm.xlu1 %642, %v97_v17   ;;  %v536_v17 = vor.u32 %v614_v14, %v535_v13 }
  0x8b   :  { %402 = vmatpush.bf16.msra.mxu3 %v540_v18 }
  0x8c   :  { %389 = vmatpush.bf16.msra.mxu2 %v536_v17 }
  0x8f   :  { %v100_v26 = vpop.permute.xlu0 %99 }
  0x90   :  { %v102_v31 = vmul.f32 %v100_v26, %v856_v27  ;;  %v103_v32 = vmul.f32 %v100_v26, %v858_v28 }
  0x93   :  { %v432_v44 = vpop.xlane.xlu2 %431 }
  0x9b   :  { %v412_v52 = vpop.permute.xlu2 %411 }
  0xfc   :  { %v107_v33 = vpop.permute.xlu1 %106 }
  0xfd   :  { %v109_v34 = vmul.f32 %v107_v33, %v860_v29  ;;  %v110_v35 = vmul.f32 %v107_v33, %v862_v30 }
  0xff   :  { %v111_v36 = vadd.f32 %v109_v34, %v102_v31  ;;  %v112_v37 = vadd.f32 %v110_v35, %v103_v32 }
 0x101   :  { %v113_v38 = vpack.c.bf16 %v111_v36, %v111_v36  ;;  %v114_v39 = vpack.c.bf16 %v112_v37, %v112_v37 }
 0x103   :  { %252 = vmatmul.bf16.vlgmr.msra.gmra.mxu0 %v113_v38  ;;  %265 = vmatmul.bf16.vlgmr.msra.gmra.mxu1 %v114_v39 }
 0x180   :  { %v253_v23 = vpop.f32.mrf.mxu0  ;;  %v266_v24 = vpop.f32.mrf.mxu1 }
 0x181   :  { %v254_v26 = vadd.f32 %v253_v23, %v147_v19 }
 0x183   :  { %v267_v31 = vadd.f32 %v266_v24, %v254_v26 }
 0x185   :  { %v270_v32 = vmul.f32 %v267_v31, %v267_v31 }
 0x187   :  { %v271_v33 = vmul.f32 %v270_v32, %v267_v31 }
 0x188   :  { %v255_v34 = vpop.f32.mrf.mxu0  ;;  %v268_v35 = vpop.f32.mrf.mxu1 }
 0x189   :  { %v272_v36 = vmul.f32 0.044715, %v271_v33 }
 0x18b   :  { %v273_v37 = vadd.f32 %v272_v36, %v267_v31 }
 0x18d   :  { %v274_v38 = vmul.f32 0.7978846, %v273_v37 }
 0x18f   :  { %645 = vtanh.f32 %v274_v38 }
 0x195   :  { %v646_v39 = vpop.eup %645 }
 0x196   :  { %v276_v40 = vadd.f32 1.0, %v646_v39 }
 0x198   :  { %v277_v41 = vmul.f32 0.5, %v276_v40 }
 0x19a   :  { %v278_v42 = vmul.f32 %v277_v41, %v267_v31 }
 0x19c   :  { %v279_v43 = vpack.c.bf16 %v278_v42, %v278_v42 }
 0x19e   :  { %390 = vmatmul.bf16.vlgmr.msra.gmra.mxu2 %v279_v43  ;;  %403 = vmatmul.bf16.vlgmr.msra.gmra.mxu3 %v279_v43 }
 0x221   :  { %v391_v48 = vpop.f32.mrf.mxu2  ;;  %v404_v49 = vpop.f32.mrf.mxu3 }
 0x222   :  { %v392_v50 = vadd.f32 %v391_v48, %v298_v46  ;;  %v405_v51 = vadd.f32 %v404_v49, %v299_v47 }
 0x224   :  { %v408_v53 = vsub.f32 %v860_v29, %v392_v50  ;;  %v409_v54 = vsub.f32 %v862_v30, %v405_v51  ;;  %v433_v29 = vadd.f32 1e-08, %v432_v44 }
 0x226   :  { %v414_v55 = vmul.f32 %v412_v52, %v408_v53  ;;  %v415_v56 = vmul.f32 %v412_v52, %v409_v54  ;;  %v420_v57 = vmul.f32 %v408_v53, %v408_v53  ;;  %v421_v58 = vmul.f32 %v409_v54, %v409_v54 }
 0x227   :  { %647 = vlog2.f32 %v433_v29 }
 0x228   :  { %v416_v59 = vadd.f32 %v414_v55, %v856_v27  ;;  %v417_v60 = vadd.f32 %v415_v56, %v858_v28  ;;  %v422_v61 = vadd.f32 %v421_v58, %v420_v57  ;;  %v426_v27 = vmul.f32 %v851_v0, %v851_v0 }
 0x229   :  { %v393_v62 = vpop.f32.mrf.mxu2  ;;  %v406_v63 = vpop.f32.mrf.mxu3 }
 0x22a   :  { %418 = vst [vmem:[#allocation10] sm:$0xff] %v416_v59  ;;  %423 = vadd.xlane.f32.xlu1 %v422_v61 }
 0x22b   :  { %419 = vst [vmem:[#allocation10 + $0x8] sm:$0xff] %v417_v60 }
 0x22c   :  { %456 = dma.vmem_to_hbm [thread:$0]  %s452_s30, 256, %s454_s11, [#allocation4]  }
 0x22d   :  { %v648_v2 = vpop.eup %647 }
 0x22e   :  { %v435_v3 = vmul.f32 0.6931472, %v648_v2 }
 0x29d   :  { %v424_v28 = vpop.xlane.xlu1 %423 }
 0x29e   :  { %v427_v30 = vmul.f32 %v426_v27, %v424_v28  ;;  %v425_v8 = vmul.f32 0.00390625, %v424_v28 }
 0x2a0   :  { %v436_v1 = vadd.f32 1e-08, %v427_v30 }
 0x2a2   :  { %649 = vlog2.f32 %v436_v1 }
 0x2a8   :  { %v650_v4 = vpop.eup %649 }
 0x2a9   :  { %v438_v5 = vmul.f32 0.6931472, %v650_v4 }
 0x2ab   :  { %v439_v6 = vsub.f32 %v435_v3, %v438_v5 }
 0x2ad   :  { %v440_v7 = vmul.f32 4.3429446, %v439_v6 }
 0x2af   :  { %v441_v9 = vsub.f32 0.0, %v440_v7 }
 0x2b1   :  { %v443_v10 = vsel %vm442_vm0, %v425_v8, %v441_v9 }
 0x2b2   :  { %445 = vst.msk [vmem:[%s899_s8] sm:$0xff] %vm444_vm1, %v443_v10 }
 0x2b3   :  { %777 = dma.done.wait [#allocation4], 256  }
 0x2b4   :  { %778 = vsyncadd [#allocation4], 4294967040 }
 0x2b5   :  { %465 = vsyncpa [#allocation3], 1 }
 0x2b6   :  { %466 = vsyncpa [#allocation6], 1 }
 0x2b7   :  { %467 = vsyncpa [#allocation9], 1 }
 0x2b8   :  { %468 = vsyncpa [#allocation4], 1 }

</bundles_post_ra>
